<compile_context>
chip_gen: v6e
topology: v6e:2x2x1
jax: 0.10.0
libtpu: 0.0.40
codegen_flags: <defaults>
</compile_context>

<pallas_src>
import functools

import jax
import jax.numpy as jnp
from jax.experimental import pallas as pl
from jax.experimental.pallas import tpu as pltpu


def _wrap_shift(y, shift, M):
    """result[:, m] = y[:, (m + shift) % M]  (static shift, lane-axis rotate)."""
    s = shift % M
    if s == 0:
        return y
    return jnp.concatenate([y[:, s:], y[:, :s]], axis=1)


def _taps_from_flat(y_flat, mask, M, Wrow):
    """Build the (9*C, M) im2col patch matrix of a 3x3 / pad=1 / stride=1 conv
    from a channels-major flat activation y_flat (C, M), using cyclic lane
    shifts + precomputed {0,1} border masks (no padded scratch round trip).
    Row order is tap-major (kh*3+kw) then channel, matching the weight matrix.
    """
    taps = []
    for kh in range(3):
        for kw in range(3):
            t = kh * 3 + kw
            shift = (kh - 1) * Wrow + (kw - 1)      # flat-index offset of tap
            rolled = _wrap_shift(y_flat, shift, M)
            taps.append(rolled * mask[t:t + 1, :])  # zero out-of-image taps
    return jnp.concatenate(taps, axis=0)            # (9*C, M)


def _block_kernel(x_ref, w1_ref, w2_ref, g_ref, b_ref, mask_ref, o_ref, *,
                  N, H, W, Ho, Wo, Cin, Cout, stride, eps):
    # x_ref:    (Cin, N*H*W) f32 if stride == 1 else (Cin, N, H, W) f32
    # w1_ref:   (Cout, 9*Cin)  bf16   (row o, col (kh*3+kw)*Cin + c)
    # w2_ref:   (Cout, 9*Cout) bf16
    # g_ref/b_ref: (Cout, 1) f32      BatchNorm affine params
    # mask_ref: (9, M) f32 {0,1}      border-validity mask per tap
    # o_ref:    (Cout, M) f32         lane-dense output slab
    M = N * Ho * Wo
    mask = mask_ref[...]

    # ---- conv1: one im2col patch matrix + a single K=9*Cin MXU dot ---------
    if stride == 1:
        patches1 = _taps_from_flat(x_ref[...], mask, M, Wo)
    else:
        # Generic-stride fallback: pad via concatenation, strided windows.
        x4 = x_ref[...]                                     # (Cin, N, H, W)
        zc = jnp.zeros((Cin, N, H, 1), x4.dtype)
        xw = jnp.concatenate([zc, x4, zc], axis=3)          # (Cin, N, H, W+2)
        zr = jnp.zeros((Cin, N, 1, W + 2), x4.dtype)
        xp = jnp.concatenate([zr, xw, zr], axis=2)          # (Cin, N, H+2, W+2)
        taps = []
        for kh in range(3):
            for kw in range(3):
                win = xp[:, :, kh:kh + stride * (Ho - 1) + 1:stride,
                            kw:kw + stride * (Wo - 1) + 1:stride]
                taps.append(win.reshape(Cin, M))
        patches1 = jnp.concatenate(taps, axis=0)            # (9*Cin, M)

    acc1 = jnp.dot(w1_ref[...], patches1.astype(jnp.bfloat16),
                   preferred_element_type=jnp.float32)      # (Cout, M) f32

    # ---- BatchNorm2d (training-mode batch stats, single pass) + ReLU -------
    inv_m = 1.0 / M
    s1 = jnp.sum(acc1, axis=1, keepdims=True)               # (Cout, 1)
    s2 = jnp.sum(acc1 * acc1, axis=1, keepdims=True)        # (Cout, 1)
    mean = s1 * inv_m
    var = jnp.maximum(s2 * inv_m - mean * mean, 0.0)        # biased variance
    y = (acc1 - mean) * jax.lax.rsqrt(var + eps)
    y = jnp.maximum(y * g_ref[...] + b_ref[...], 0.0)       # (Cout, M)

    # ---- conv2 (stride 1): im2col via lane shifts + single K=9*Cout dot ----
    patches2 = _taps_from_flat(y, mask, M, Wo)              # (9*Cout, M)
    acc2 = jnp.dot(w2_ref[...], patches2.astype(jnp.bfloat16),
                   preferred_element_type=jnp.float32)      # (Cout, M)

    # ---- ReLU + lane-dense store -------------------------------------------
    o_ref[...] = jnp.maximum(acc2, 0.0)


def block_forward(x_nchw, w1_oihw, w2_oihw, gamma, beta, *, stride=1, eps=1e-5):
    """Pallas forward of Block.  Inputs follow PyTorch conventions (NCHW/OIHW)."""
    N, Cin, H, W = x_nchw.shape
    Cout = w1_oihw.shape[0]
    Ho = (H + 2 - 3) // stride + 1
    Wo = (W + 2 - 3) // stride + 1
    M = N * Ho * Wo

    # Boundary glue (layout only, no padding pass): channels-major activations
    # with flattened spatial so the kernel works on lane-dense (C, M) slabs.
    x_c = jnp.transpose(x_nchw, (1, 0, 2, 3)).astype(jnp.float32)   # (Cin,N,H,W)
    x_kernel = x_c.reshape(Cin, N * H * W) if stride == 1 else x_c
    w1m = jnp.transpose(w1_oihw, (0, 2, 3, 1)).reshape(Cout, 9 * Cin)
    w2m = jnp.transpose(w2_oihw, (0, 2, 3, 1)).reshape(Cout, 9 * Cout)
    w1m = w1m.astype(jnp.bfloat16)
    w2m = w2m.astype(jnp.bfloat16)
    g = gamma.reshape(Cout, 1).astype(jnp.float32)
    b = beta.reshape(Cout, 1).astype(jnp.float32)

    # {0,1} border masks for the 9 taps of a 3x3/pad=1 window over the output
    # grid (used by conv2 always, and by conv1 when stride == 1).
    m_idx = jnp.arange(M, dtype=jnp.int32)
    ho = (m_idx // Wo) % Ho
    wo = m_idx % Wo
    rows = []
    for kh in range(3):
        for kw in range(3):
            dh, dw = kh - 1, kw - 1
            rows.append((ho + dh >= 0) & (ho + dh < Ho) &
                        (wo + dw >= 0) & (wo + dw < Wo))
    mask = jnp.stack(rows, axis=0).astype(jnp.float32)               # (9, M)

    kernel = functools.partial(_block_kernel, N=N, H=H, W=W, Ho=Ho, Wo=Wo,
                               Cin=Cin, Cout=Cout, stride=stride, eps=eps)

    out_cm = pl.pallas_call(
        kernel,
        out_shape=jax.ShapeDtypeStruct((Cout, M), jnp.float32),
        in_specs=[pl.BlockSpec(memory_space=pltpu.MemorySpace.VMEM)] * 6,
        out_specs=pl.BlockSpec(memory_space=pltpu.MemorySpace.VMEM),
        compiler_params=pltpu.CompilerParams(vmem_limit_bytes=32 * 1024 * 1024),
    )(x_kernel, w1m, w2m, g, b, mask)

    # Glue back to PyTorch NCHW.
    return jnp.transpose(out_cm.reshape(Cout, N, Ho, Wo), (1, 0, 2, 3))


def block_reference(x, w1, w2, gamma, beta, *, stride=1, eps=1e-5,
                    bf16_matmul=True):
    """Pure-JAX reference matching torch semantics (NCHW).  bf16_matmul=True
    mirrors the kernel's precision policy (bf16 operands, f32 accumulation)."""
    dn = ("NCHW", "OIHW", "NCHW")

    def conv(a, w, s):
        if bf16_matmul:
            a, w, prec = a.astype(jnp.bfloat16), w.astype(jnp.bfloat16), None
        else:
            prec = jax.lax.Precision.HIGHEST
        return jax.lax.conv_general_dilated(
            a, w, (s, s), ((1, 1), (1, 1)), dimension_numbers=dn,
            preferred_element_type=jnp.float32, precision=prec)

    y = conv(x, w1, stride)
    mean = jnp.mean(y, axis=(0, 2, 3), keepdims=True)
    var = jnp.mean((y - mean) ** 2, axis=(0, 2, 3), keepdims=True)
    y = (y - mean) * jax.lax.rsqrt(var + eps)
    y = y * gamma.reshape(1, -1, 1, 1) + beta.reshape(1, -1, 1, 1)
    y = jnp.maximum(y, 0.0)
    y = conv(y, w2, 1)
    return jnp.maximum(y, 0.0)


if __name__ == "__main__":
    # Small shapes consistent with the module: n_input=4, n_output=8, stride=1.
    N, Cin, Cout, H, W, stride = 2, 4, 8, 16, 16, 1

    key = jax.random.PRNGKey(0)
    kx, k1, k2 = jax.random.split(key, 3)
    x = jax.random.normal(kx, (N, Cin, H, W), jnp.float32)

    # Deterministic parameter init (kaiming-uniform-like bounds, like nn.Conv2d).
    b1 = 1.0 / (Cin * 9) ** 0.5
    w1 = jax.random.uniform(k1, (Cout, Cin, 3, 3), jnp.float32, -b1, b1)
    b2 = 1.0 / (Cout * 9) ** 0.5
    w2 = jax.random.uniform(k2, (Cout, Cout, 3, 3), jnp.float32, -b2, b2)
    gamma = jnp.ones((Cout,), jnp.float32)   # BatchNorm weight init
    beta = jnp.zeros((Cout,), jnp.float32)   # BatchNorm bias init

    out = jax.block_until_ready(block_forward(x, w1, w2, gamma, beta, stride=stride))
    assert out.shape == (N, Cout, (H - 1) // stride + 1, (W - 1) // stride + 1), out.shape

    # Tight check against a precision-matched reference (bf16 ops, f32 accum).
    ref = block_reference(x, w1, w2, gamma, beta, stride=stride, bf16_matmul=True)
    err = float(jnp.max(jnp.abs(out - ref)))
    assert err < 2e-3, f"max abs err vs bf16-matched reference = {err}"

    # Loose sanity check against a full-f32 HIGHEST-precision reference
    # (bounds the bf16-operand rounding introduced for MXU speed).
    ref32 = block_reference(x, w1, w2, gamma, beta, stride=stride, bf16_matmul=False)
    err32 = float(jnp.max(jnp.abs(out - ref32)))
    assert err32 < 1e-1, f"max abs err vs f32 reference = {err32}"

    print("KERNEL_OK")
</pallas_src>

<mosaic_0001>
module attributes {stable_mosaic.version = 11 : i64} {
  func.func @_block_kernel(%arg0: memref<4x512xf32, #tpu.memory_space<vmem>>, %arg1: memref<8x36xbf16, #tpu.memory_space<vmem>>, %arg2: memref<8x72xbf16, #tpu.memory_space<vmem>>, %arg3: memref<8x1xf32, #tpu.memory_space<vmem>>, %arg4: memref<8x1xf32, #tpu.memory_space<vmem>>, %arg5: memref<9x512xf32, #tpu.memory_space<vmem>>, %arg6: memref<8x512xf32, #tpu.memory_space<vmem>>) attributes {dimension_semantics = [], scalar_prefetch = 0 : i64, scratch_operands = 0 : i64, tpu.core_type = #tpu.core_type<tc>} {
    %c0 = arith.constant 0 : index
    %c0_0 = arith.constant 0 : index
    %0 = vector.load %arg5[%c0, %c0_0] : memref<9x512xf32, #tpu.memory_space<vmem>>, vector<9x512xf32>
    %c0_1 = arith.constant 0 : index
    %c0_2 = arith.constant 0 : index
    %1 = vector.load %arg0[%c0_1, %c0_2] : memref<4x512xf32, #tpu.memory_space<vmem>>, vector<4x512xf32>
    %2 = vector.extract_strided_slice %1 {offsets = [0, 495], sizes = [4, 17], strides = [1, 1]} : vector<4x512xf32> to vector<4x17xf32>
    %3 = vector.extract_strided_slice %1 {offsets = [0, 0], sizes = [4, 495], strides = [1, 1]} : vector<4x512xf32> to vector<4x495xf32>
    %4 = tpu.concatenate %2, %3 in 1 : vector<4x17xf32>, vector<4x495xf32> -> vector<4x512xf32>
    %5 = vector.extract_strided_slice %0 {offsets = [0, 0], sizes = [1, 512], strides = [1, 1]} : vector<9x512xf32> to vector<1x512xf32>
    %6 = vector.broadcast %5 : vector<1x512xf32> to vector<4x512xf32>
    %7 = arith.mulf %4, %6 : vector<4x512xf32>
    %8 = vector.extract_strided_slice %1 {offsets = [0, 496], sizes = [4, 16], strides = [1, 1]} : vector<4x512xf32> to vector<4x16xf32>
    %9 = vector.extract_strided_slice %1 {offsets = [0, 0], sizes = [4, 496], strides = [1, 1]} : vector<4x512xf32> to vector<4x496xf32>
    %10 = tpu.concatenate %8, %9 in 1 : vector<4x16xf32>, vector<4x496xf32> -> vector<4x512xf32>
    %11 = vector.extract_strided_slice %0 {offsets = [1, 0], sizes = [1, 512], strides = [1, 1]} : vector<9x512xf32> to vector<1x512xf32>
    %12 = vector.broadcast %11 : vector<1x512xf32> to vector<4x512xf32>
    %13 = arith.mulf %10, %12 : vector<4x512xf32>
    %14 = vector.extract_strided_slice %1 {offsets = [0, 497], sizes = [4, 15], strides = [1, 1]} : vector<4x512xf32> to vector<4x15xf32>
    %15 = vector.extract_strided_slice %1 {offsets = [0, 0], sizes = [4, 497], strides = [1, 1]} : vector<4x512xf32> to vector<4x497xf32>
    %16 = tpu.concatenate %14, %15 in 1 : vector<4x15xf32>, vector<4x497xf32> -> vector<4x512xf32>
    %17 = vector.extract_strided_slice %0 {offsets = [2, 0], sizes = [1, 512], strides = [1, 1]} : vector<9x512xf32> to vector<1x512xf32>
    %18 = vector.broadcast %17 : vector<1x512xf32> to vector<4x512xf32>
    %19 = arith.mulf %16, %18 : vector<4x512xf32>
    %20 = vector.extract_strided_slice %1 {offsets = [0, 511], sizes = [4, 1], strides = [1, 1]} : vector<4x512xf32> to vector<4x1xf32>
    %21 = vector.extract_strided_slice %1 {offsets = [0, 0], sizes = [4, 511], strides = [1, 1]} : vector<4x512xf32> to vector<4x511xf32>
    %22 = tpu.concatenate %20, %21 in 1 : vector<4x1xf32>, vector<4x511xf32> -> vector<4x512xf32>
    %23 = vector.extract_strided_slice %0 {offsets = [3, 0], sizes = [1, 512], strides = [1, 1]} : vector<9x512xf32> to vector<1x512xf32>
    %24 = vector.broadcast %23 : vector<1x512xf32> to vector<4x512xf32>
    %25 = arith.mulf %22, %24 : vector<4x512xf32>
    %26 = vector.extract_strided_slice %0 {offsets = [4, 0], sizes = [1, 512], strides = [1, 1]} : vector<9x512xf32> to vector<1x512xf32>
    %27 = vector.broadcast %26 : vector<1x512xf32> to vector<4x512xf32>
    %28 = arith.mulf %1, %27 : vector<4x512xf32>
    %29 = vector.extract_strided_slice %1 {offsets = [0, 1], sizes = [4, 511], strides = [1, 1]} : vector<4x512xf32> to vector<4x511xf32>
    %30 = vector.extract_strided_slice %1 {offsets = [0, 0], sizes = [4, 1], strides = [1, 1]} : vector<4x512xf32> to vector<4x1xf32>
    %31 = tpu.concatenate %29, %30 in 1 : vector<4x511xf32>, vector<4x1xf32> -> vector<4x512xf32>
    %32 = vector.extract_strided_slice %0 {offsets = [5, 0], sizes = [1, 512], strides = [1, 1]} : vector<9x512xf32> to vector<1x512xf32>
    %33 = vector.broadcast %32 : vector<1x512xf32> to vector<4x512xf32>
    %34 = arith.mulf %31, %33 : vector<4x512xf32>
    %35 = vector.extract_strided_slice %1 {offsets = [0, 15], sizes = [4, 497], strides = [1, 1]} : vector<4x512xf32> to vector<4x497xf32>
    %36 = vector.extract_strided_slice %1 {offsets = [0, 0], sizes = [4, 15], strides = [1, 1]} : vector<4x512xf32> to vector<4x15xf32>
    %37 = tpu.concatenate %35, %36 in 1 : vector<4x497xf32>, vector<4x15xf32> -> vector<4x512xf32>
    %38 = vector.extract_strided_slice %0 {offsets = [6, 0], sizes = [1, 512], strides = [1, 1]} : vector<9x512xf32> to vector<1x512xf32>
    %39 = vector.broadcast %38 : vector<1x512xf32> to vector<4x512xf32>
    %40 = arith.mulf %37, %39 : vector<4x512xf32>
    %41 = vector.extract_strided_slice %1 {offsets = [0, 16], sizes = [4, 496], strides = [1, 1]} : vector<4x512xf32> to vector<4x496xf32>
    %42 = vector.extract_strided_slice %1 {offsets = [0, 0], sizes = [4, 16], strides = [1, 1]} : vector<4x512xf32> to vector<4x16xf32>
    %43 = tpu.concatenate %41, %42 in 1 : vector<4x496xf32>, vector<4x16xf32> -> vector<4x512xf32>
    %44 = vector.extract_strided_slice %0 {offsets = [7, 0], sizes = [1, 512], strides = [1, 1]} : vector<9x512xf32> to vector<1x512xf32>
    %45 = vector.broadcast %44 : vector<1x512xf32> to vector<4x512xf32>
    %46 = arith.mulf %43, %45 : vector<4x512xf32>
    %47 = vector.extract_strided_slice %1 {offsets = [0, 17], sizes = [4, 495], strides = [1, 1]} : vector<4x512xf32> to vector<4x495xf32>
    %48 = vector.extract_strided_slice %1 {offsets = [0, 0], sizes = [4, 17], strides = [1, 1]} : vector<4x512xf32> to vector<4x17xf32>
    %49 = tpu.concatenate %47, %48 in 1 : vector<4x495xf32>, vector<4x17xf32> -> vector<4x512xf32>
    %50 = vector.extract_strided_slice %0 {offsets = [8, 0], sizes = [1, 512], strides = [1, 1]} : vector<9x512xf32> to vector<1x512xf32>
    %51 = vector.broadcast %50 : vector<1x512xf32> to vector<4x512xf32>
    %52 = arith.mulf %49, %51 : vector<4x512xf32>
    %53 = tpu.concatenate %7, %13, %19, %25, %28, %34, %40, %46, %52 in 0 : vector<4x512xf32>, vector<4x512xf32>, vector<4x512xf32>, vector<4x512xf32>, vector<4x512xf32>, vector<4x512xf32>, vector<4x512xf32>, vector<4x512xf32>, vector<4x512xf32> -> vector<36x512xf32>
    %c0_3 = arith.constant 0 : index
    %c0_4 = arith.constant 0 : index
    %54 = vector.load %arg1[%c0_3, %c0_4] : memref<8x36xbf16, #tpu.memory_space<vmem>>, vector<8x36xbf16>
    %55 = arith.truncf %53 : vector<36x512xf32> to vector<36x512xbf16>
    %cst = arith.constant dense<0.000000e+00> : vector<8x512xf32>
    %56 = tpu.matmul %54, %55, %cst {dimension_numbers = #tpu.dot_dimension_numbers<[1], [0], [0], [1], [0, 0, 1, 1], [], []>} : vector<8x36xbf16>, vector<36x512xbf16>, vector<8x512xf32> -> vector<8x512xf32>
    %cst_5 = arith.constant dense<0.000000e+00> : vector<8xf32>
    %57 = vector.multi_reduction <add>, %56, %cst_5 [1] : vector<8x512xf32> to vector<8xf32>
    %58 = vector.shape_cast %57 : vector<8xf32> to vector<8x1xf32>
    %59 = arith.mulf %56, %56 : vector<8x512xf32>
    %cst_6 = arith.constant dense<0.000000e+00> : vector<8xf32>
    %60 = vector.multi_reduction <add>, %59, %cst_6 [1] : vector<8x512xf32> to vector<8xf32>
    %61 = vector.shape_cast %60 : vector<8xf32> to vector<8x1xf32>
    %cst_7 = arith.constant 0.001953125 : f32
    %62 = vector.broadcast %cst_7 : f32 to vector<8x1xf32>
    %63 = arith.mulf %58, %62 : vector<8x1xf32>
    %cst_8 = arith.constant 0.001953125 : f32
    %64 = vector.broadcast %cst_8 : f32 to vector<8x1xf32>
    %65 = arith.mulf %61, %64 : vector<8x1xf32>
    %66 = arith.mulf %63, %63 : vector<8x1xf32>
    %67 = arith.subf %65, %66 : vector<8x1xf32>
    %cst_9 = arith.constant 0.000000e+00 : f32
    %68 = vector.broadcast %cst_9 : f32 to vector<8x1xf32>
    %69 = arith.maximumf %67, %68 : vector<8x1xf32>
    %70 = vector.broadcast %63 : vector<8x1xf32> to vector<8x512xf32>
    %71 = arith.subf %56, %70 : vector<8x512xf32>
    %cst_10 = arith.constant 9.99999974E-6 : f32
    %72 = vector.broadcast %cst_10 : f32 to vector<8x1xf32>
    %73 = arith.addf %69, %72 : vector<8x1xf32>
    %74 = math.rsqrt %73 : vector<8x1xf32>
    %75 = vector.broadcast %74 : vector<8x1xf32> to vector<8x512xf32>
    %76 = arith.mulf %71, %75 : vector<8x512xf32>
    %c0_11 = arith.constant 0 : index
    %c0_12 = arith.constant 0 : index
    %77 = vector.load %arg3[%c0_11, %c0_12] : memref<8x1xf32, #tpu.memory_space<vmem>>, vector<8x1xf32>
    %78 = vector.broadcast %77 : vector<8x1xf32> to vector<8x512xf32>
    %79 = arith.mulf %76, %78 : vector<8x512xf32>
    %c0_13 = arith.constant 0 : index
    %c0_14 = arith.constant 0 : index
    %80 = vector.load %arg4[%c0_13, %c0_14] : memref<8x1xf32, #tpu.memory_space<vmem>>, vector<8x1xf32>
    %81 = vector.broadcast %80 : vector<8x1xf32> to vector<8x512xf32>
    %82 = arith.addf %79, %81 : vector<8x512xf32>
    %cst_15 = arith.constant 0.000000e+00 : f32
    %83 = vector.broadcast %cst_15 : f32 to vector<8x512xf32>
    %84 = arith.maximumf %82, %83 : vector<8x512xf32>
    %85 = vector.extract_strided_slice %84 {offsets = [0, 495], sizes = [8, 17], strides = [1, 1]} : vector<8x512xf32> to vector<8x17xf32>
    %86 = vector.extract_strided_slice %84 {offsets = [0, 0], sizes = [8, 495], strides = [1, 1]} : vector<8x512xf32> to vector<8x495xf32>
    %87 = tpu.concatenate %85, %86 in 1 : vector<8x17xf32>, vector<8x495xf32> -> vector<8x512xf32>
    %88 = vector.extract_strided_slice %0 {offsets = [0, 0], sizes = [1, 512], strides = [1, 1]} : vector<9x512xf32> to vector<1x512xf32>
    %89 = vector.broadcast %88 : vector<1x512xf32> to vector<8x512xf32>
    %90 = arith.mulf %87, %89 : vector<8x512xf32>
    %91 = vector.extract_strided_slice %84 {offsets = [0, 496], sizes = [8, 16], strides = [1, 1]} : vector<8x512xf32> to vector<8x16xf32>
    %92 = vector.extract_strided_slice %84 {offsets = [0, 0], sizes = [8, 496], strides = [1, 1]} : vector<8x512xf32> to vector<8x496xf32>
    %93 = tpu.concatenate %91, %92 in 1 : vector<8x16xf32>, vector<8x496xf32> -> vector<8x512xf32>
    %94 = vector.extract_strided_slice %0 {offsets = [1, 0], sizes = [1, 512], strides = [1, 1]} : vector<9x512xf32> to vector<1x512xf32>
    %95 = vector.broadcast %94 : vector<1x512xf32> to vector<8x512xf32>
    %96 = arith.mulf %93, %95 : vector<8x512xf32>
    %97 = vector.extract_strided_slice %84 {offsets = [0, 497], sizes = [8, 15], strides = [1, 1]} : vector<8x512xf32> to vector<8x15xf32>
    %98 = vector.extract_strided_slice %84 {offsets = [0, 0], sizes = [8, 497], strides = [1, 1]} : vector<8x512xf32> to vector<8x497xf32>
    %99 = tpu.concatenate %97, %98 in 1 : vector<8x15xf32>, vector<8x497xf32> -> vector<8x512xf32>
    %100 = vector.extract_strided_slice %0 {offsets = [2, 0], sizes = [1, 512], strides = [1, 1]} : vector<9x512xf32> to vector<1x512xf32>
    %101 = vector.broadcast %100 : vector<1x512xf32> to vector<8x512xf32>
    %102 = arith.mulf %99, %101 : vector<8x512xf32>
    %103 = vector.extract_strided_slice %84 {offsets = [0, 511], sizes = [8, 1], strides = [1, 1]} : vector<8x512xf32> to vector<8x1xf32>
    %104 = vector.extract_strided_slice %84 {offsets = [0, 0], sizes = [8, 511], strides = [1, 1]} : vector<8x512xf32> to vector<8x511xf32>
    %105 = tpu.concatenate %103, %104 in 1 : vector<8x1xf32>, vector<8x511xf32> -> vector<8x512xf32>
    %106 = vector.extract_strided_slice %0 {offsets = [3, 0], sizes = [1, 512], strides = [1, 1]} : vector<9x512xf32> to vector<1x512xf32>
    %107 = vector.broadcast %106 : vector<1x512xf32> to vector<8x512xf32>
    %108 = arith.mulf %105, %107 : vector<8x512xf32>
    %109 = vector.extract_strided_slice %0 {offsets = [4, 0], sizes = [1, 512], strides = [1, 1]} : vector<9x512xf32> to vector<1x512xf32>
    %110 = vector.broadcast %109 : vector<1x512xf32> to vector<8x512xf32>
    %111 = arith.mulf %84, %110 : vector<8x512xf32>
    %112 = vector.extract_strided_slice %84 {offsets = [0, 1], sizes = [8, 511], strides = [1, 1]} : vector<8x512xf32> to vector<8x511xf32>
    %113 = vector.extract_strided_slice %84 {offsets = [0, 0], sizes = [8, 1], strides = [1, 1]} : vector<8x512xf32> to vector<8x1xf32>
    %114 = tpu.concatenate %112, %113 in 1 : vector<8x511xf32>, vector<8x1xf32> -> vector<8x512xf32>
    %115 = vector.extract_strided_slice %0 {offsets = [5, 0], sizes = [1, 512], strides = [1, 1]} : vector<9x512xf32> to vector<1x512xf32>
    %116 = vector.broadcast %115 : vector<1x512xf32> to vector<8x512xf32>
    %117 = arith.mulf %114, %116 : vector<8x512xf32>
    %118 = vector.extract_strided_slice %84 {offsets = [0, 15], sizes = [8, 497], strides = [1, 1]} : vector<8x512xf32> to vector<8x497xf32>
    %119 = vector.extract_strided_slice %84 {offsets = [0, 0], sizes = [8, 15], strides = [1, 1]} : vector<8x512xf32> to vector<8x15xf32>
    %120 = tpu.concatenate %118, %119 in 1 : vector<8x497xf32>, vector<8x15xf32> -> vector<8x512xf32>
    %121 = vector.extract_strided_slice %0 {offsets = [6, 0], sizes = [1, 512], strides = [1, 1]} : vector<9x512xf32> to vector<1x512xf32>
    %122 = vector.broadcast %121 : vector<1x512xf32> to vector<8x512xf32>
    %123 = arith.mulf %120, %122 : vector<8x512xf32>
    %124 = vector.extract_strided_slice %84 {offsets = [0, 16], sizes = [8, 496], strides = [1, 1]} : vector<8x512xf32> to vector<8x496xf32>
    %125 = vector.extract_strided_slice %84 {offsets = [0, 0], sizes = [8, 16], strides = [1, 1]} : vector<8x512xf32> to vector<8x16xf32>
    %126 = tpu.concatenate %124, %125 in 1 : vector<8x496xf32>, vector<8x16xf32> -> vector<8x512xf32>
    %127 = vector.extract_strided_slice %0 {offsets = [7, 0], sizes = [1, 512], strides = [1, 1]} : vector<9x512xf32> to vector<1x512xf32>
    %128 = vector.broadcast %127 : vector<1x512xf32> to vector<8x512xf32>
    %129 = arith.mulf %126, %128 : vector<8x512xf32>
    %130 = vector.extract_strided_slice %84 {offsets = [0, 17], sizes = [8, 495], strides = [1, 1]} : vector<8x512xf32> to vector<8x495xf32>
    %131 = vector.extract_strided_slice %84 {offsets = [0, 0], sizes = [8, 17], strides = [1, 1]} : vector<8x512xf32> to vector<8x17xf32>
    %132 = tpu.concatenate %130, %131 in 1 : vector<8x495xf32>, vector<8x17xf32> -> vector<8x512xf32>
    %133 = vector.extract_strided_slice %0 {offsets = [8, 0], sizes = [1, 512], strides = [1, 1]} : vector<9x512xf32> to vector<1x512xf32>
    %134 = vector.broadcast %133 : vector<1x512xf32> to vector<8x512xf32>
    %135 = arith.mulf %132, %134 : vector<8x512xf32>
    %136 = tpu.concatenate %90, %96, %102, %108, %111, %117, %123, %129, %135 in 0 : vector<8x512xf32>, vector<8x512xf32>, vector<8x512xf32>, vector<8x512xf32>, vector<8x512xf32>, vector<8x512xf32>, vector<8x512xf32>, vector<8x512xf32>, vector<8x512xf32> -> vector<72x512xf32>
    %c0_16 = arith.constant 0 : index
    %c0_17 = arith.constant 0 : index
    %137 = vector.load %arg2[%c0_16, %c0_17] : memref<8x72xbf16, #tpu.memory_space<vmem>>, vector<8x72xbf16>
    %138 = arith.truncf %136 : vector<72x512xf32> to vector<72x512xbf16>
    %cst_18 = arith.constant dense<0.000000e+00> : vector<8x512xf32>
    %139 = tpu.matmul %137, %138, %cst_18 {dimension_numbers = #tpu.dot_dimension_numbers<[1], [0], [0], [1], [0, 0, 1, 1], [], []>} : vector<8x72xbf16>, vector<72x512xbf16>, vector<8x512xf32> -> vector<8x512xf32>
    %cst_19 = arith.constant 0.000000e+00 : f32
    %140 = vector.broadcast %cst_19 : f32 to vector<8x512xf32>
    %141 = arith.maximumf %139, %140 : vector<8x512xf32>
    %c0_20 = arith.constant 0 : index
    %c0_21 = arith.constant 0 : index
    %142 = vector.load %arg6[%c0_20, %c0_21] : memref<8x512xf32, #tpu.memory_space<vmem>>, vector<8x512xf32>
    tpu.vector_store %arg6[%c0_20, %c0_21], %141 {strides = array<i32>} : memref<8x512xf32, #tpu.memory_space<vmem>>, vector<8x512xf32>,
    return
  }
}

</mosaic_0001>

<bundles_post_ra>
// kernel: tpu_custom_call.1
= control target key start
LH: loop header
LB: loop body
LE: loop exit
PB: predicated region body
PF: predicated region fallthrough
CT: control target
= control target key end

     0   :  { %11 = vsyncpa [#allocation3], 0  ;;  %s1650_s0 = inlined_call_operand.vmem [shape: f32[4,512], index: 0, kind: input, shape index: {}]   ;;  %s1651_s1 = inlined_call_operand.hbm [shape: bf16[8,36], index: 1, kind: input, shape index: {}]   ;;  %s1652_s2 = inlined_call_operand.vmem [shape: bf16[8,72], index: 2, kind: input, shape index: {}]   ;;  %s1653_s3 = inlined_call_operand.vmem [shape: f32[8,1], index: 3, kind: input, shape index: {}]   ;;  %s1654_s4 = inlined_call_operand.vmem [shape: f32[8,1], index: 4, kind: input, shape index: {}]   ;;  %s1655_s5 = inlined_call_operand.hbm [shape: f32[9,512], index: 5, kind: input, shape index: {}]   ;;  %s1656_s6 = inlined_call_operand.hbm [shape: f32[8,512], index: 6, kind: output, shape index: {}]  }
   0x1   :  { %12 = vsyncpa [#allocation6], 0 }
   0x2   :  { %13 = vsyncpa [#allocation4], 0  ;;  %s1048_s21 = smov [#allocation2]   ;;  %s1049_s23 = smov [#allocation5]  }
   0x3   :  { %s22_s22 = sshll.u32 %s1048_s21, 4  ;;  %s37_s24 = sshll.u32 %s1049_s23, 4  ;;  %s23_s22 = int_to_ptr.vmem [resolvable:$true] %s22_s22  ;;  %s38_s24 = int_to_ptr.vmem [resolvable:$true] %s37_s24 }
   0x4   :  { %s990_s25 = scalar_lea.vmem %s23_s22, 64  ;;  %p995_p1 = scmp.lt.s32.totalorder %s23_s22, %s23_s22 }
   0x5   :  { %p991_p0 = scmp.ne.s32.totalorder %s23_s22, %s990_s25  ;;  %p996_p2 = scmp.lt.s32.totalorder %s990_s25, %s990_s25 }
   0x7   :  { %p997_p3 = por %p996_p2, %p995_p1 }
   0x9   :  { %p998_p4 = pnand %p997_p3, %p991_p0 }
   0xb   :  { %1001 = shalt.err (!%p998_p4)
}
   0xc   :  { %25 = dma.hbm_to_vmem [thread:$0]  %s1651_s1, 64, %s23_s22, [#allocation3]  }
   0xd   :  { %s1010_s28 = scalar_lea.vmem %s38_s24, 1024  ;;  %p1015_p6 = scmp.lt.s32.totalorder %s38_s24, %s38_s24 }
   0xe   :  { %p1011_p5 = scmp.ne.s32.totalorder %s38_s24, %s1010_s28  ;;  %p1016_p7 = scmp.lt.s32.totalorder %s1010_s28, %s1010_s28 }
  0x10   :  { %p1017_p8 = por %p1016_p7, %p1015_p6 }
  0x12   :  { %p1018_p9 = pnand %p1017_p8, %p1011_p5 }
  0x14   :  { %1021 = shalt.err (!%p1018_p9)
}
  0x15   :  { %s1050_s29 = smov 512   ;;  %s1051_s30 = smov 32  }
  0x16   :  { %43 = dma.hbm_to_vmem [thread:$0]  %s1655_s5, 1024, %s38_s24, [#allocation6], %s1050_s29, %s1050_s29, %s1051_s30  }
  0x17   :  { %1042 = dma.done.wait [#allocation3], 64  }
  0x18   :  { %1043 = vsyncadd [#allocation3], 4294967232 }
  0x19   :  { %1044 = dma.done.wait [#allocation6], 1024  }
  0x1a   :  { %1045 = vsyncadd [#allocation6], 4294966272  ;;  %v1106_v0 = vld [vmem:[%s1650_s0 + $0x8] sm:$0xff]  ;;  %v1111_v1 = vld [vmem:[%s1650_s0] sm:$0xff]  ;;  %s1052_s12 = smov 111   ;;  %s1053_s5 = smov 127   ;;  %v83_v5 = vlaneseq }
  0x1b   :  { %361 = vrot.lane.b32.xlu1 %v1106_v0, %s1052_s12  ;;  %357 = vrot.lane.b32.xlu0 %v1111_v1, %s1052_s12  ;;  %v67_v2 = vcombine.high %v1111_v1, %v1111_v1  ;;  %s1054_s13 = smov 112   ;;  %s1055_s0 = smov 113   ;;  %v62_v3 = vcombine.high %v1106_v0, %v1106_v0  ;;  %v1657_v4 = vmov 0   ;;  %v1180_v12 = vld [vmem:[#allocation5 + $0x8] sm:$0xff]  ;;  %v1182_v13 = vld [vmem:[#allocation5] sm:$0xff]  ;;  %vm365_vm0 = vcmask 908288  }
  0x1c   :  { %s1056_s14 = smov 16   ;;  %s1057_s15 = smov 1   ;;  %528 = vmatprep.mubr.bf16.mxu0 %v1657_v4  ;;  %569 = vmatprep.mubr.bf16.mxu1 %v1657_v4  ;;  %v1173_v8 = vshrl.u32 %v83_v5, 7  ;;  %v1187_v15 = vld [vmem:[#allocation5 + $0x20] ss:$0 sm:$0xff]  ;;  %vm251_vm1 = vcmask 1039360  }
  0x1d   :  { %s1058_s16 = smov 17   ;;  %s1059_s17 = smov 15   ;;  %976 = vset.pattern.permute.xlu0 %v1657_v4  ;;  %977 = vset.pattern.permute.xlu1 %v1657_v4  ;;  %v1189_v16 = vld [vmem:[#allocation5 + $0x28] ss:$0 sm:$0xff]  ;;  %vm327_vm2 = vcmask 916480   ;;  %vm483_vm3 = vcmask 1041408  }
  0x1e   :  { %v1178_v11 = vsub.s32 4, %v1173_v8  ;;  %v1185_v14 = vsub.s32 5, %v1173_v8  ;;  %v1205_v24 = vsub.s32 7, %v1173_v8  ;;  %v1237_v38 = vsub.s32 6, %v1173_v8  ;;  %v1268_v61 = vld [vmem:[#allocation5 + $0x30] ss:$0 sm:$0xff] }
  0x1f   :  { %247 = vrot.lane.b32.xlu0 %v1106_v0, %s1053_s5  ;;  %245 = vrot.lane.b32.xlu1 %v67_v2, %s1053_s5  ;;  %vm289_vm4 = vcmask 924672   ;;  %vm449_vm5 = vcmask 1043456   ;;  %v1270_v62 = vld [vmem:[#allocation5 + $0x38] ss:$0 sm:$0xff]  ;;  %vm112_vm6 = vcmask 130048   ;;  %vm188_vm7 = vcmask 7168  }
  0x20   :  { %v1193_v19 = vrot.slane %v1182_v13, %v1178_v11  ;;  %v1197_v20 = vrot.slane %v1180_v12, %v1178_v11  ;;  %v1210_v26 = vrot.slane %v1180_v12, %v1185_v14  ;;  %v1216_v28 = vrot.slane %v1182_v13, %v1185_v14  ;;  %s1061_s22 = smov [#allocation7]  }
  0x21   :  { %v1228_v35 = vrot.slane %v1180_v12, %v1205_v24  ;;  %v1234_v37 = vrot.slane %v1182_v13, %v1205_v24  ;;  %v1252_v48 = vrot.slane %v1182_v13, %v1237_v38  ;;  %v1256_v49 = vrot.slane %v1180_v12, %v1237_v38  ;;  %s940_s23 = sshll.u32 %s1061_s22, 4  ;;  %s941_s23 = int_to_ptr.vmem [resolvable:$true] %s940_s23 }
  0x22   :  { %v237_v32 = vcombine.low %v1193_v19, %v1197_v20  ;;  %vm74_vm8 = vcmask 138240   ;;  %vm150_vm9 = vcmask 121856   ;;  %vm479_vm10 = vcmask 293888   ;;  %p1027_p11 = scmp.lt.s32.totalorder %s941_s23, %s941_s23 }
  0x23   :  { %321 = vrot.lane.b32.xlu1 %v67_v2, %s1054_s13  ;;  %359 = vrot.lane.b32.xlu0 %v67_v2, %s1052_s12  ;;  %vm828_vm11 = vcmask 588800  }
  0x24   :  { %v241_v44 = vmul.f32 %v237_v32, %v1111_v1 }
  0x26   :  { %v421_v54 = vcombine.high %v241_v44, %v241_v44 }
  0x27   :  { %243 = vrot.lane.b32.xlu1 %v1111_v1, %s1053_s5  ;;  %323 = vrot.lane.b32.xlu0 %v1106_v0, %s1054_s13 }
  0x2b   :  { %283 = vrot.lane.b32.xlu1 %v67_v2, %s1055_s0  ;;  %319 = vrot.lane.b32.xlu0 %v1111_v1, %s1054_s13 }
  0x2f   :  { %281 = vrot.lane.b32.xlu1 %v1111_v1, %s1055_s0  ;;  %285 = vrot.lane.b32.xlu0 %v1106_v0, %s1055_s0 }
  0x33   :  { %106 = vrot.lane.b32.xlu1 %v1111_v1, %s1056_s14  ;;  %363 = vrot.lane.b32.xlu0 %v62_v3, %s1052_s12 }
  0x37   :  { %182 = vrot.lane.b32.xlu1 %v1111_v1, %s1057_s15  ;;  %108 = vrot.lane.b32.xlu0 %v67_v2, %s1056_s14 }
  0x3b   :  { %249 = vrot.lane.b32.xlu1 %v62_v3, %s1053_s5  ;;  %184 = vrot.lane.b32.xlu0 %v67_v2, %s1057_s15 }
  0x3f   :  { %103 = vrot.lane.b32.xlu1 %v62_v3, %s1056_s14  ;;  %325 = vrot.lane.b32.xlu0 %v62_v3, %s1054_s13 }
  0x43   :  { %68 = vrot.lane.b32.xlu1 %v1111_v1, %s1058_s16  ;;  %179 = vrot.lane.b32.xlu0 %v62_v3, %s1057_s15 }
  0x47   :  { %144 = vrot.lane.b32.xlu1 %v1111_v1, %s1059_s17  ;;  %70 = vrot.lane.b32.xlu0 %v67_v2, %s1058_s16 }
  0x4b   :  { %287 = vrot.lane.b32.xlu1 %v62_v3, %s1055_s0  ;;  %146 = vrot.lane.b32.xlu0 %v67_v2, %s1059_s17 }
  0x4f   :  { %141 = vrot.lane.b32.xlu1 %v62_v3, %s1059_s17  ;;  %63 = vrot.lane.b32.xlu0 %v62_v3, %s1058_s16 }
  0x53   :  { %186 = vrot.lane.b32.xlu1 %v1106_v0, %s1057_s15  ;;  %110 = vrot.lane.b32.xlu0 %v1106_v0, %s1056_s14 }
  0x57   :  { %148 = vrot.lane.b32.xlu1 %v1106_v0, %s1059_s17  ;;  %72 = vrot.lane.b32.xlu0 %v1106_v0, %s1058_s16 }
  0x8d   :  { %v1169_v6 = vpop.permute.xlu1 %361  ;;  %v1171_v7 = vpop.permute.xlu0 %357 }
  0x91   :  { %v1175_v9 = vpop.permute.xlu0 %247  ;;  %v246_v10 = vpop.permute.xlu1 %245 }
  0x92   :  { %v253_v33 = vsel %vm251_vm1, %v246_v10, %v1175_v9 }
  0x93   :  { %v278_v40 = vmul.f32 %v1210_v26, %v253_v33 }
  0x95   :  { %v322_v17 = vpop.permute.xlu1 %321  ;;  %v360_v18 = vpop.permute.xlu0 %359  ;;  %v430_v50 = vrot.slane %v278_v40, 4 }
  0x96   :  { %v366_v21 = vsel %vm365_vm0, %v1171_v7, %v360_v18  ;;  %v367_v22 = vsel %vm365_vm0, %v360_v18, %v1169_v6 }
  0x97   :  { %v391_v23 = vmul.f32 %v1187_v15, %v366_v21  ;;  %v392_v25 = vmul.f32 %v1189_v16, %v367_v22  ;;  %v459_v2 = vsel %vm449_vm5, %v421_v54, %v430_v50 }
  0x99   :  { %v1212_v27 = vpop.permute.xlu1 %243  ;;  %v1218_v29 = vpop.permute.xlu0 %323  ;;  %v476_v30 = vpack.c.bf16 %v392_v25, %v392_v25  ;;  %v475_v31 = vpack.c.bf16 %v391_v23, %v391_v23  ;;  %v1282_v23 = vld [vmem:[#allocation5 + $0x10] sm:$0xff]  ;;  %v1284_v25 = vld [vmem:[#allocation5 + $0x18] sm:$0xff] }
  0x9a   :  { %v252_v34 = vsel %vm251_vm1, %v1212_v27, %v246_v10  ;;  %v329_v39 = vsel %vm327_vm2, %v322_v17, %v1218_v29  ;;  %v1325_v54 = vrot.slane %v1284_v25, %v1185_v14 }
  0x9b   :  { %954 = vmatprep.subr.msk.bf16.mxu0 %vm483_vm3, %v476_v30  ;;  %v485_v36 = vsel %vm483_vm3, %v475_v31, 0  ;;  %v277_v41 = vmul.f32 %v1216_v28, %v252_v34  ;;  %v354_v46 = vmul.f32 %v1228_v35, %v329_v39 }
  0x9c   :  { %507 = vmatpush1.bf16.msra.mxu0 %v485_v36  ;;  %v1298_v36 = vrot.slane %v1284_v25, %v1178_v11  ;;  %1667 = vst [vmem:[#allocation13_spill] sm:$0xff] %v1325_v54 }
  0x9d   :  { %v284_v42 = vpop.permute.xlu1 %283  ;;  %v1243_v43 = vpop.permute.xlu0 %319  ;;  %v429_v51 = vrot.slane %v277_v41, 4  ;;  %v442_v57 = vrot.slane %v354_v46, 4 }
  0x9e   :  { %v328_v45 = vsel %vm327_vm2, %v1243_v43, %v322_v17  ;;  %1665 = vst [vmem:[#allocation11_spill] sm:$0xff] %v1298_v36 }
  0x9f   :  { %v353_v47 = vmul.f32 %v1234_v37, %v328_v45  ;;  %v458_v5 = vsel %vm449_vm5, %v241_v44, %v429_v51  ;;  %v1307_v44 = vsub.s32 1, %v1173_v8  ;;  %v199_v45 = vsub.s32 3, %v1173_v8 }
  0xa0   :  { %v1321_v51 = vrot.slane %v1282_v23, %v1185_v14 }
  0xa1   :  { %v1258_v52 = vpop.permute.xlu1 %281  ;;  %v1260_v53 = vpop.permute.xlu0 %285  ;;  %v441_v58 = vrot.slane %v353_v47, 4  ;;  %v1317_v50 = vrot.slane %v1180_v12, %v1307_v44 }
  0xa2   :  { %v290_v55 = vsel %vm289_vm4, %v1258_v52, %v284_v42  ;;  %v291_v56 = vsel %vm289_vm4, %v284_v42, %v1260_v53 }
  0xa3   :  { %v315_v59 = vmul.f32 %v1252_v48, %v290_v55  ;;  %v316_v60 = vmul.f32 %v1256_v49, %v291_v56  ;;  %1666 = vst [vmem:[#allocation12_spill] sm:$0xff] %v1317_v50  ;;  %v1328_v55 = vsub.s32 0, %v1173_v8  ;;  %v1335_v56 = vrot.slane %v1182_v13, %v1307_v44 }
  0xa5   :  { %v1272_v63 = vpop.permute.xlu1 %106  ;;  %v364_v1 = vpop.permute.xlu0 %363  ;;  %v463_v3 = vsel %vm449_vm5, %v316_v60, %v442_v57  ;;  %v462_v10 = vsel %vm449_vm5, %v315_v59, %v441_v58  ;;  %1669 = vst [vmem:[#allocation15_spill] sm:$0xff] %v1335_v56  ;;  %v1339_v57 = vrot.slane %v1282_v23, %v1205_v24  ;;  %v1343_v58 = vrot.slane %v1284_v25, %v1205_v24 }
  0xa6   :  { %v368_v17 = vsel %vm365_vm0, %v1169_v6, %v364_v1  ;;  %v374_v18 = vsel %vm365_vm0, %v364_v1, %v1171_v7  ;;  %v472_v21 = vpack.c.bf16 %v463_v3, %v459_v2  ;;  %v471_v22 = vpack.c.bf16 %v462_v10, %v458_v5 }
  0xa7   :  { %v393_v30 = vmul.f32 %v1268_v61, %v368_v17  ;;  %v394_v31 = vmul.f32 %v1270_v62, %v374_v18  ;;  %v1294_v7 = vrot.slane %v1282_v23, %v1178_v11  ;;  %v1352_v2 = vrot.slane %v1182_v13, %v199_v45 }
  0xa8   :  { %508 = vmatprep.subr.bf16.mxu0 %v472_v21  ;;  %v161_v5 = vsub.s32 2, %v1173_v8  ;;  %v1369_v17 = vrot.slane %v1180_v12, %v1328_v55  ;;  %v1373_v18 = vrot.slane %v1282_v23, %v1237_v38 }
  0xa9   :  { %v1288_v32 = vpop.permute.xlu1 %182  ;;  %v1290_v33 = vpop.permute.xlu0 %108  ;;  %509 = vmatpush1.bf16.msra.mxu0 %v471_v22  ;;  %v478_v6 = vpack.c.bf16 %v394_v31, %v394_v31  ;;  %v477_v34 = vpack.c.bf16 %v393_v30, %v393_v30  ;;  %v238_v42 = vcombine.low %v1294_v7, %v1298_v36 }
  0xaa   :  { %v113_v24 = vsel %vm112_vm6, %v1272_v63, %v1290_v33  ;;  %1670 = vst [vmem:[#allocation16_spill] sm:$0xff] %v1369_v17 }
  0xab   :  { %956 = vmatprep.subr.msk.bf16.mxu1 %vm483_vm3, %v478_v6  ;;  %v491_v39 = vsel %vm483_vm3, %v477_v34, 0  ;;  %v1313_v47 = vmul.f32 %v238_v42, %v1106_v0  ;;  %v1331_v0 = vrot.slane %v1180_v12, %v199_v45  ;;  %v138_v8 = vmul.f32 %v1317_v50, %v113_v24 }
  0xac   :  { %548 = vmatpush1.bf16.msra.mxu1 %v491_v39  ;;  %v1396_v42 = vrot.slane %v1182_v13, %v161_v5 }
  0xad   :  { %v250_v40 = vpop.permute.xlu1 %249  ;;  %v1302_v41 = vpop.permute.xlu0 %184  ;;  %1668 = vst [vmem:[#allocation14_spill] sm:$0xff] %v1331_v0  ;;  %v422_v3 = vcombine.high %v1313_v47, %v1313_v47 }
  0xae   :  { %v254_v14 = vsel %vm251_vm1, %v1175_v9, %v250_v40  ;;  %v260_v59 = vsel %vm251_vm1, %v250_v40, %v1212_v27  ;;  %v189_v9 = vsel %vm188_vm7, %v1288_v32, %v1302_v41  ;;  %v1393_v40 = vrot.slane %v1180_v12, %v161_v5 }
  0xaf   :  { %v279_v21 = vmul.f32 %v1321_v51, %v254_v14  ;;  %v280_v22 = vmul.f32 %v1325_v54, %v260_v59  ;;  %v1406_v14 = vrot.slane %v1284_v25, %v199_v45  ;;  %v1410_v59 = vrot.slane %v1282_v23, %v1307_v44 }
  0xb1   :  { %v1310_v46 = vpop.permute.xlu1 %103  ;;  %v326_v11 = vpop.permute.xlu0 %325  ;;  %v431_v24 = vrot.slane %v279_v21, 4  ;;  %v432_v12 = vrot.slane %v280_v22, 4 }
  0xb2   :  { %v330_v27 = vsel %vm327_vm2, %v1218_v29, %v326_v11  ;;  %v336_v10 = vsel %vm327_vm2, %v326_v11, %v1243_v43  ;;  %v1379_v29 = vrot.slane %v1284_v25, %v1237_v38  ;;  %v214_v43 = vmul.f32 %v1331_v0, %v189_v9 }
  0xb3   :  { %v120_v30 = vsel %vm112_vm6, %v1310_v46, %v1272_v63  ;;  %v355_v31 = vmul.f32 %v1339_v57, %v330_v27  ;;  %v356_v39 = vmul.f32 %v1343_v58, %v336_v10  ;;  %v1400_v11 = vrot.slane %v1182_v13, %v1328_v55 }
  0xb4   :  { %v1403_v63 = vrot.slane %v1282_v23, %v199_v45  ;;  %v137_v9 = vmul.f32 %v1335_v56, %v120_v30  ;;  %v400_v13 = vrot.slane %v138_v8, 4  ;;  %v412_v10 = vrot.slane %v214_v43, 4 }
  0xb5   :  { %v69_v60 = vpop.permute.xlu1 %68  ;;  %v1349_v1 = vpop.permute.xlu0 %179  ;;  %v443_v4 = vrot.slane %v355_v31, 4  ;;  %v444_v36 = vrot.slane %v356_v39, 4  ;;  %v1429_v39 = vrot.slane %v1284_v25, %v1307_v44 }
  0xb6   :  { %v196_v27 = vsel %vm188_vm7, %v1349_v1, %v1288_v32  ;;  %v399_v31 = vrot.slane %v137_v9, 4 }
  0xb7   :  { %v213_v30 = vmul.f32 %v1352_v2, %v196_v27 }
  0xb9   :  { %v145_v6 = vpop.permute.xlu1 %144  ;;  %v1387_v34 = vpop.permute.xlu0 %70  ;;  %v411_v56 = vrot.slane %v213_v30, 4  ;;  %v1455_v30 = vrot.slane %v1284_v25, %v1328_v55 }
  0xba   :  { %v75_v38 = vsel %vm74_vm8, %v69_v60, %v1387_v34 }
  0xbb   :  { %v100_v50 = vmul.f32 %v1369_v17, %v75_v38  ;;  %v461_v38 = vsel %vm449_vm5, %v422_v3, %v432_v12 }
  0xbd   :  { %v288_v0 = vpop.permute.xlu1 %287  ;;  %v147_v45 = vpop.permute.xlu0 %146  ;;  %v451_v27 = vsel %vm449_vm5, %v100_v50, %v400_v13  ;;  %v1442_v50 = vrot.slane %v1282_v23, %v161_v5 }
  0xbe   :  { %v292_v54 = vsel %vm289_vm4, %v1260_v53, %v288_v0  ;;  %v298_v21 = vsel %vm289_vm4, %v288_v0, %v1258_v52  ;;  %v151_v22 = vsel %vm150_vm9, %v145_v6, %v147_v45  ;;  %v460_v52 = vsel %vm449_vm5, %v1313_v47, %v431_v24 }
  0xbf   :  { %v317_v32 = vmul.f32 %v1373_v18, %v292_v54  ;;  %v318_v8 = vmul.f32 %v1379_v29, %v298_v21  ;;  %v176_v43 = vmul.f32 %v1393_v40, %v151_v22 }
  0xc1   :  { %v142_v53 = vpop.permute.xlu1 %141  ;;  %v64_v0 = vpop.permute.xlu0 %63  ;;  %v455_v54 = vsel %vm449_vm5, %v176_v43, %v412_v10  ;;  %v465_v21 = vsel %vm449_vm5, %v318_v8, %v444_v36  ;;  %v464_v22 = vsel %vm449_vm5, %v317_v32, %v443_v4  ;;  %v1445_v36 = vrot.slane %v1284_v25, %v161_v5 }
  0xc2   :  { %v158_v9 = vsel %vm150_vm9, %v142_v53, %v145_v6  ;;  %v82_v3 = vsel %vm74_vm8, %v64_v0, %v69_v60  ;;  %v468_v12 = vpack.c.bf16 %v455_v54, %v451_v27  ;;  %v474_v44 = vpack.c.bf16 %v465_v21, %v461_v38 }
  0xc3   :  { %v175_v17 = vmul.f32 %v1396_v42, %v158_v9  ;;  %v99_v47 = vmul.f32 %v1400_v11, %v82_v3  ;;  %v473_v24 = vpack.c.bf16 %v464_v22, %v460_v52  ;;  %v1451_v10 = vrot.slane %v1282_v23, %v1328_v55  ;;  %v466_v22 = vld [vmem:[#allocation2] sm:$0xf] }
  0xc4   :  { %510 = vmatprep.subr.bf16.mxu0 %v468_v12  ;;  %549 = vmatprep.subr.bf16.mxu1 %v474_v44 }
  0xc5   :  { %v187_v4 = vpop.permute.xlu1 %186  ;;  %v111_v6 = vpop.permute.xlu0 %110  ;;  %550 = vmatpush1.bf16.msra.mxu1 %v473_v24  ;;  %v450_v60 = vsel %vm449_vm5, %v99_v47, %v399_v31  ;;  %v454_v13 = vsel %vm449_vm5, %v175_v17, %v411_v56 }
  0xc6   :  { %v190_v32 = vsel %vm188_vm7, %v1302_v41, %v187_v4  ;;  %v191_v5 = vsel %vm188_vm7, %v187_v4, %v1349_v1  ;;  %v114_v8 = vsel %vm112_vm6, %v1290_v33, %v111_v6  ;;  %v115_v56 = vsel %vm112_vm6, %v111_v6, %v1310_v46 }
  0xc7   :  { %v215_v17 = vmul.f32 %v1403_v63, %v190_v32  ;;  %v216_v23 = vmul.f32 %v1406_v14, %v191_v5  ;;  %v139_v43 = vmul.f32 %v1410_v59, %v114_v8  ;;  %v140_v25 = vmul.f32 %v1429_v39, %v115_v56 }
  0xc8   :  { %v467_v55 = vpack.c.bf16 %v454_v13, %v450_v60  ;;  %v1671_v4 = vmov 0  }
  0xc9   :  { %v413_v41 = vrot.slane %v215_v17, 4  ;;  %v414_v31 = vrot.slane %v216_v23, 4  ;;  %v401_v38 = vrot.slane %v139_v43, 4  ;;  %v402_v1 = vrot.slane %v140_v25, 4  ;;  %v149_v52 = vpop.permute.xlu1 %148  ;;  %v73_v27 = vpop.permute.xlu0 %72 }
  0xca   :  { %511 = vmatpush1.bf16.msra.mxu0 %v467_v55  ;;  %v152_v33 = vsel %vm150_vm9, %v147_v45, %v149_v52  ;;  %v153_v46 = vsel %vm150_vm9, %v149_v52, %v142_v53  ;;  %v76_v54 = vsel %vm74_vm8, %v1387_v34, %v73_v27  ;;  %v77_v21 = vsel %vm74_vm8, %v73_v27, %v64_v0 }
  0xcb   :  { %v177_v9 = vmul.f32 %v1442_v50, %v152_v33  ;;  %v178_v3 = vmul.f32 %v1445_v36, %v153_v46  ;;  %v101_v12 = vmul.f32 %v1451_v10, %v76_v54  ;;  %v102_v44 = vmul.f32 %v1455_v30, %v77_v21  ;;  %v617_v33 = vld [vmem:[%s1654_s4] sm:$0xff] }
  0xcc   :  { %v607_v46 = vld [vmem:[%s1653_s3] sm:$0xff] }
  0xcd   :  { %955 = vmatmul.mubr.msk.bf16.vlgmr.msra.gmra.mxu0 %vm479_vm10, %v466_v22  ;;  %v453_v45 = vsel %vm449_vm5, %v102_v44, %v402_v1  ;;  %v457_v53 = vsel %vm449_vm5, %v178_v3, %v414_v31  ;;  %v452_v47 = vsel %vm449_vm5, %v101_v12, %v401_v38  ;;  %v456_v34 = vsel %vm449_vm5, %v177_v9, %v413_v41 }
  0xce   :  { %v470_v0 = vpack.c.bf16 %v457_v53, %v453_v45  ;;  %v469_v24 = vpack.c.bf16 %v456_v34, %v452_v47  ;;  %876 = vmatprep.mubr.bf16.mxu0 %v1671_v4 }
  0xd0   :  { %551 = vmatprep.subr.bf16.mxu1 %v470_v0 }
  0xd1   :  { %552 = vmatpush1.bf16.msra.mxu1 %v469_v24 }
  0xd4   :  { %957 = vmatmul.mubr.msk.bf16.vlgmr.msra.gmra.mxu1 %vm479_vm10, %v466_v22 }
  0xd5   :  { %917 = vmatprep.mubr.bf16.mxu1 %v1671_v4 }
 0x18d   :  { %v530_v6 = vpop.f32.mrf.mxu0 }
 0x18e   :  { %v583_v13 = vmul.f32 %v530_v6, %v530_v6 }
 0x18f   :  { %v532_v60 = vpop.f32.mrf.mxu0 }
 0x190   :  { %v584_v32 = vmul.f32 %v532_v60, %v532_v60  ;;  %v578_v8 = vadd.f32 %v532_v60, %v530_v6 }
 0x191   :  { %v534_v5 = vpop.f32.mrf.mxu0 }
 0x192   :  { %v587_v25 = vadd.f32 %v584_v32, %v583_v13 }
 0x193   :  { %v535_v56 = vpop.f32.mrf.mxu0 }
 0x194   :  { %v571_v17 = vpop.f32.mrf.mxu1 }
 0x195   :  { %v585_v23 = vmul.f32 %v571_v17, %v571_v17  ;;  %v579_v43 = vadd.f32 %v578_v8, %v571_v17 }
 0x196   :  { %v573_v55 = vpop.f32.mrf.mxu1 }
 0x197   :  { %v580_v41 = vadd.f32 %v579_v43, %v573_v55  ;;  %v586_v31 = vmul.f32 %v573_v55, %v573_v55  ;;  %v588_v38 = vadd.f32 %v587_v25, %v585_v23 }
 0x198   :  { %v575_v1 = vpop.f32.mrf.mxu1 }
 0x199   :  { %581 = vadd.xlane.f32.xlu0 %v580_v41  ;;  %v589_v52 = vadd.f32 %v588_v38, %v586_v31 }
 0x19a   :  { %v576_v27 = vpop.f32.mrf.mxu1 }
 0x19b   :  { %590 = vadd.xlane.f32.xlu1 %v589_v52 }
 0x1ac   :  { %620 = vperm.xlu1 %977, %v617_v33  }
 0x1af   :  { %610 = vperm.xlu0 %976, %v607_v46  }
 0x222   :  { %v582_v54 = vpop.xlane.xlu0 %581 }
 0x223   :  { %v592_v21 = vmul.f32 0.001953125, %v582_v54 }
 0x224   :  { %v591_v22 = vpop.xlane.xlu1 %590 }
 0x225   :  { %v593_v9 = vmul.f32 0.001953125, %v591_v22  ;;  %v594_v3 = vmul.f32 %v592_v21, %v592_v21  ;;  %v597_v53 = vsub.f32 %v530_v6, %v592_v21  ;;  %v598_v47 = vsub.f32 %v532_v60, %v592_v21 }
 0x226   :  { %v599_v34 = vsub.f32 %v571_v17, %v592_v21  ;;  %v600_v43 = vsub.f32 %v573_v55, %v592_v21 }
 0x227   :  { %v595_v12 = vsub.f32 %v593_v9, %v594_v3 }
 0x228   :  { %v621_v5 = vpop.permute.xlu1 %620 }
 0x229   :  { %v596_v44 = vmax.f32 %v595_v12, 0.0 }
 0x22a   :  { %v611_v24 = vpop.permute.xlu0 %610 }
 0x22b   :  { %v601_v45 = vadd.f32 1e-05, %v596_v44 }
 0x22d   :  { %980 = vrsqrt.f32 %v601_v45 }
 0x23a   :  { %v981_v0 = vpop.eup %980 }
 0x23b   :  { %v603_v4 = vmul.f32 %v981_v0, %v597_v53  ;;  %v604_v13 = vmul.f32 %v981_v0, %v598_v47  ;;  %v605_v32 = vmul.f32 %v981_v0, %v599_v34  ;;  %v606_v31 = vmul.f32 %v981_v0, %v600_v43 }
 0x23d   :  { %v613_v8 = vmul.f32 %v611_v24, %v603_v4  ;;  %v614_v56 = vmul.f32 %v611_v24, %v604_v13  ;;  %v615_v23 = vmul.f32 %v611_v24, %v605_v32  ;;  %v616_v6 = vmul.f32 %v611_v24, %v606_v31 }
 0x23f   :  { %v623_v25 = vadd.f32 %v621_v5, %v613_v8  ;;  %v625_v41 = vadd.f32 %v621_v5, %v615_v23  ;;  %v624_v38 = vadd.f32 %v621_v5, %v614_v56  ;;  %v626_v17 = vadd.f32 %v621_v5, %v616_v6 }
 0x241   :  { %v1492_v1 = vmax.f32 %v623_v25, 0.0  ;;  %v1494_v52 = vmax.f32 %v625_v41, 0.0  ;;  %v1500_v60 = vmax.f32 %v624_v38, 0.0  ;;  %v1510_v55 = vmax.f32 %v626_v17, 0.0 }
 0x243   :  { %748 = vrot.lane.b32.xlu0 %v1494_v52, %s1055_s0  ;;  %786 = vrot.lane.b32.xlu1 %v1492_v1, %s1052_s12 }
 0x247   :  { %765 = vrot.lane.b32.xlu0 %v1492_v1, %s1054_s13  ;;  %788 = vrot.lane.b32.xlu1 %v1500_v60, %s1052_s12 }
 0x24b   :  { %769 = vrot.lane.b32.xlu0 %v1494_v52, %s1054_s13  ;;  %790 = vrot.lane.b32.xlu1 %v1494_v52, %s1052_s12 }
 0x24f   :  { %723 = vrot.lane.b32.xlu0 %v1492_v1, %s1053_s5  ;;  %792 = vrot.lane.b32.xlu1 %v1510_v55, %s1052_s12 }
 0x253   :  { %727 = vrot.lane.b32.xlu0 %v1494_v52, %s1053_s5  ;;  %744 = vrot.lane.b32.xlu1 %v1492_v1, %s1055_s0 }
 0x257   :  { %677 = vrot.lane.b32.xlu0 %v1510_v55, %s1059_s17  ;;  %746 = vrot.lane.b32.xlu1 %v1500_v60, %s1055_s0 }
 0x25b   :  { %682 = vrot.lane.b32.xlu0 %v1500_v60, %s1059_s17  ;;  %750 = vrot.lane.b32.xlu1 %v1510_v55, %s1055_s0 }
 0x25f   :  { %698 = vrot.lane.b32.xlu0 %v1510_v55, %s1057_s15  ;;  %767 = vrot.lane.b32.xlu1 %v1500_v60, %s1054_s13 }
 0x263   :  { %703 = vrot.lane.b32.xlu0 %v1500_v60, %s1057_s15  ;;  %771 = vrot.lane.b32.xlu1 %v1510_v55, %s1054_s13 }
 0x267   :  { %632 = vrot.lane.b32.xlu0 %v1510_v55, %s1058_s16  ;;  %725 = vrot.lane.b32.xlu1 %v1500_v60, %s1053_s5 }
 0x26b   :  { %640 = vrot.lane.b32.xlu0 %v1500_v60, %s1058_s16  ;;  %729 = vrot.lane.b32.xlu1 %v1510_v55, %s1053_s5 }
 0x26f   :  { %656 = vrot.lane.b32.xlu0 %v1510_v55, %s1056_s14  ;;  %680 = vrot.lane.b32.xlu1 %v1492_v1, %s1059_s17 }
 0x273   :  { %661 = vrot.lane.b32.xlu0 %v1500_v60, %s1056_s14  ;;  %684 = vrot.lane.b32.xlu1 %v1494_v52, %s1059_s17 }
 0x277   :  { %701 = vrot.lane.b32.xlu1 %v1492_v1, %s1057_s15 }
 0x27b   :  { %705 = vrot.lane.b32.xlu1 %v1494_v52, %s1057_s15 }
 0x27f   :  { %638 = vrot.lane.b32.xlu1 %v1492_v1, %s1058_s16 }
 0x283   :  { %642 = vrot.lane.b32.xlu1 %v1494_v52, %s1058_s16 }
 0x287   :  { %659 = vrot.lane.b32.xlu1 %v1492_v1, %s1056_s14 }
 0x28b   :  { %663 = vrot.lane.b32.xlu1 %v1494_v52, %s1056_s14 }
 0x2b5   :  { %v749_v27 = vpop.permute.xlu0 %748  ;;  %v787_v33 = vpop.permute.xlu1 %786 }
 0x2b9   :  { %v766_v46 = vpop.permute.xlu0 %765  ;;  %v789_v54 = vpop.permute.xlu1 %788 }
 0x2ba   :  { %v794_v21 = vsel %vm365_vm0, %v787_v33, %v789_v54 }
 0x2bb   :  { %v803_v22 = vmul.f32 %v1187_v15, %v794_v21 }
 0x2bd   :  { %v770_v9 = vpop.permute.xlu0 %769  ;;  %v791_v3 = vpop.permute.xlu1 %790  ;;  %v824_v44 = vpack.c.bf16 %v803_v22, %v803_v22 }
 0x2be   :  { %v795_v12 = vsel %vm365_vm0, %v789_v54, %v791_v3 }
 0x2bf   :  { %v804_v45 = vmul.f32 %v1189_v16, %v795_v12  ;;  %v833_v15 = vsel %vm449_vm5, %v824_v44, 0 }
 0x2c1   :  { %v825_v53 = vpack.c.bf16 %v804_v45, %v804_v45  ;;  %v793_v47 = vpop.permute.xlu1 %792  ;;  %v724_v24 = vpop.permute.xlu0 %723 }
 0x2c2   :  { %v796_v34 = vsel %vm365_vm0, %v791_v3, %v793_v47  ;;  %v802_v0 = vsel %vm365_vm0, %v793_v47, %v787_v33 }
 0x2c3   :  { %v805_v4 = vmul.f32 %v1268_v61, %v796_v34  ;;  %v806_v13 = vmul.f32 %v1270_v62, %v802_v0  ;;  %958 = vmatprep.subr.msk.bf16.mxu0 %vm449_vm5, %v825_v53 }
 0x2c4   :  { %851 = vmatpush1.bf16.msra.mxu0 %v833_v15 }
 0x2c5   :  { %v826_v32 = vpack.c.bf16 %v805_v4, %v805_v4  ;;  %v827_v5 = vpack.c.bf16 %v806_v13, %v806_v13  ;;  %v745_v8 = vpop.permute.xlu1 %744  ;;  %v728_v56 = vpop.permute.xlu0 %727 }
 0x2c7   :  { %960 = vmatprep.subr.msk.bf16.mxu1 %vm449_vm5, %v827_v5  ;;  %v839_v16 = vsel %vm449_vm5, %v826_v32, 0 }
 0x2c8   :  { %892 = vmatpush1.bf16.msra.mxu1 %v839_v16  ;;  %v721_v16 = vmul.f32 %v1494_v52, %v1294_v7 }
 0x2c9   :  { %v747_v23 = vpop.permute.xlu1 %746  ;;  %v1576_v25 = vpop.permute.xlu0 %677 }
 0x2ca   :  { %v752_v61 = vsel %vm289_vm4, %v745_v8, %v747_v23  ;;  %v753_v62 = vsel %vm289_vm4, %v747_v23, %v749_v27 }
 0x2cb   :  { %v761_v6 = vmul.f32 %v752_v61, %v1252_v48  ;;  %v762_v17 = vmul.f32 %v753_v62, %v1256_v49 }
 0x2cd   :  { %v751_v43 = vpop.permute.xlu1 %750  ;;  %v683_v3 = vpop.permute.xlu0 %682 }
 0x2ce   :  { %v754_v21 = vsel %vm289_vm4, %v749_v27, %v751_v43  ;;  %v760_v22 = vsel %vm289_vm4, %v751_v43, %v745_v8 }
 0x2cf   :  { %v763_v48 = vmul.f32 %v754_v21, %v1373_v18  ;;  %v764_v49 = vmul.f32 %v760_v22, %v1379_v29 }
 0x2d1   :  { %v768_v41 = vpop.permute.xlu1 %767 }
 0x2d2   :  { %v773_v31 = vsel %vm327_vm2, %v766_v46, %v768_v41  ;;  %v774_v38 = vsel %vm327_vm2, %v768_v41, %v770_v9 }
 0x2d3   :  { %v782_v33 = vmul.f32 %v773_v31, %v1234_v37  ;;  %v783_v54 = vmul.f32 %v774_v38, %v1228_v35 }
 0x2d5   :  { %v820_v12 = vpack.c.bf16 %v782_v33, %v761_v6  ;;  %v772_v44 = vpop.permute.xlu1 %771  ;;  %v821_v45 = vpack.c.bf16 %v783_v54, %v762_v17  ;;  %v1674_v6 = vld [vmem:[#allocation14_spill] sm:$0xff] }
 0x2d6   :  { %v775_v53 = vsel %vm327_vm2, %v770_v9, %v772_v44  ;;  %v781_v47 = vsel %vm327_vm2, %v772_v44, %v766_v46  ;;  %v699_v9 = vpop.permute.xlu0 %698  ;;  %v719_v46 = vmul.f32 %v1492_v1, %v1193_v19 }
 0x2d7   :  { %v784_v37 = vmul.f32 %v775_v53, %v1339_v57  ;;  %v785_v35 = vmul.f32 %v781_v47, %v1343_v58  ;;  %852 = vmatprep.subr.bf16.mxu0 %v821_v45  ;;  %v720_v57 = vmul.f32 %v1500_v60, %v1197_v20 }
 0x2d8   :  { %853 = vmatpush1.bf16.msra.mxu0 %v820_v12 }
 0x2d9   :  { %v822_v27 = vpack.c.bf16 %v784_v37, %v763_v48  ;;  %v726_v34 = vpop.permute.xlu1 %725  ;;  %v823_v0 = vpack.c.bf16 %v785_v35, %v764_v49 }
 0x2da   :  { %v731_v4 = vsel %vm251_vm1, %v724_v24, %v726_v34  ;;  %v732_v13 = vsel %vm251_vm1, %v726_v34, %v728_v56  ;;  %v704_v20 = vpop.permute.xlu0 %703 }
 0x2db   :  { %v740_v18 = vmul.f32 %v731_v4, %v1216_v28  ;;  %v741_v29 = vmul.f32 %v732_v13, %v1210_v26  ;;  %893 = vmatprep.subr.bf16.mxu1 %v823_v0  ;;  %v1672_v28 = vld [vmem:[#allocation13_spill] sm:$0xff]  ;;  %v1673_v26 = vld [vmem:[#allocation11_spill] sm:$0xff]  ;;  %v1675_v0 = vld [vmem:[#allocation16_spill] sm:$0xff] }
 0x2dc   :  { %894 = vmatpush1.bf16.msra.mxu1 %v822_v27  ;;  %v722_v23 = vmul.f32 %v1510_v55, %v1673_v26  ;;  %v1676_v13 = vld [vmem:[#allocation15_spill] sm:$0xff] }
 0x2dd   :  { %v816_v58 = vpack.c.bf16 %v740_v18, %v719_v46  ;;  %v730_v15 = vpop.permute.xlu1 %729  ;;  %v817_v32 = vpack.c.bf16 %v741_v29, %v720_v57  ;;  %v1677_v46 = vld [vmem:[#allocation12_spill] sm:$0xff] }
 0x2de   :  { %v733_v5 = vsel %vm251_vm1, %v728_v56, %v730_v15  ;;  %v739_v8 = vsel %vm251_vm1, %v730_v15, %v724_v24  ;;  %v633_v24 = vpop.permute.xlu0 %632 }
 0x2df   :  { %v742_v19 = vmul.f32 %v733_v5, %v1321_v51  ;;  %v743_v1 = vmul.f32 %v739_v8, %v1672_v28  ;;  %854 = vmatprep.subr.bf16.mxu0 %v817_v32 }
 0x2e0   :  { %855 = vmatpush1.bf16.msra.mxu0 %v816_v58 }
 0x2e1   :  { %v818_v60 = vpack.c.bf16 %v742_v19, %v721_v16  ;;  %v681_v43 = vpop.permute.xlu1 %680  ;;  %v819_v61 = vpack.c.bf16 %v743_v1, %v722_v23  ;;  %v807_v1 = vld [vmem:[%s1652_s2] sm:$0xf]  ;;  %s1022_s2 = scalar_lea.vmem %s941_s23, 512 }
 0x2e2   :  { %v686_v62 = vsel %vm150_vm9, %v681_v43, %v683_v3  ;;  %v693_v7 = vsel %vm150_vm9, %v1576_v25, %v681_v43  ;;  %v641_v21 = vpop.permute.xlu0 %640  ;;  %p1023_p10 = scmp.ne.s32.totalorder %s941_s23, %s1022_s2  ;;  %p1028_p12 = scmp.lt.s32.totalorder %s1022_s2, %s1022_s2 }
 0x2e3   :  { %895 = vmatprep.subr.bf16.mxu1 %v819_v61  ;;  %v694_v55 = vmul.f32 %v693_v7, %v1396_v42  ;;  %v695_v31 = vmul.f32 %v686_v62, %v1393_v40 }
 0x2e4   :  { %896 = vmatpush1.bf16.msra.mxu1 %v818_v60  ;;  %p1029_p13 = por %p1028_p12, %p1027_p11 }
 0x2e5   :  { %v685_v56 = vpop.permute.xlu1 %684 }
 0x2e6   :  { %v687_v33 = vsel %vm150_vm9, %v683_v3, %v685_v56  ;;  %v688_v54 = vsel %vm150_vm9, %v685_v56, %v1576_v25  ;;  %v657_v49 = vpop.permute.xlu0 %656  ;;  %p1030_p0 = pnand %p1029_p13, %p1023_p10 }
 0x2e7   :  { %v696_v42 = vmul.f32 %v687_v33, %v1442_v50  ;;  %v697_v40 = vmul.f32 %v688_v54, %v1445_v36 }
 0x2e9   :  { %v702_v51 = vpop.permute.xlu1 %701 }
 0x2ea   :  { %v707_v52 = vsel %vm188_vm7, %v702_v51, %v704_v20  ;;  %v714_v41 = vsel %vm188_vm7, %v699_v9, %v702_v51  ;;  %v662_v50 = vpop.permute.xlu0 %661 }
 0x2eb   :  { %v715_v38 = vmul.f32 %v714_v41, %v1352_v2  ;;  %v716_v17 = vmul.f32 %v707_v52, %v1674_v6 }
 0x2ed   :  { %v812_v22 = vpack.c.bf16 %v715_v38, %v694_v55  ;;  %v706_v12 = vpop.permute.xlu1 %705  ;;  %v813_v44 = vpack.c.bf16 %v716_v17, %v695_v31 }
 0x2ee   :  { %v708_v45 = vsel %vm188_vm7, %v704_v20, %v706_v12  ;;  %v709_v53 = vsel %vm188_vm7, %v706_v12, %v699_v9 }
 0x2ef   :  { %v717_v2 = vmul.f32 %v708_v45, %v1403_v63  ;;  %v718_v47 = vmul.f32 %v709_v53, %v1406_v14  ;;  %856 = vmatprep.subr.bf16.mxu0 %v813_v44 }
 0x2f0   :  { %857 = vmatpush1.bf16.msra.mxu0 %v812_v22 }
 0x2f1   :  { %v814_v3 = vpack.c.bf16 %v717_v2, %v696_v42  ;;  %v639_v25 = vpop.permute.xlu1 %638  ;;  %v815_v48 = vpack.c.bf16 %v718_v47, %v697_v40 }
 0x2f2   :  { %v644_v35 = vsel %vm74_vm8, %v639_v25, %v641_v21  ;;  %v651_v27 = vsel %vm74_vm8, %v633_v24, %v639_v25 }
 0x2f3   :  { %897 = vmatprep.subr.bf16.mxu1 %v815_v48  ;;  %v652_v14 = vmul.f32 %v651_v27, %v1400_v11  ;;  %v653_v4 = vmul.f32 %v644_v35, %v1675_v0 }
 0x2f4   :  { %898 = vmatpush1.bf16.msra.mxu1 %v814_v3 }
 0x2f5   :  { %v643_v37 = vpop.permute.xlu1 %642 }
 0x2f6   :  { %v645_v29 = vsel %vm74_vm8, %v641_v21, %v643_v37  ;;  %v646_v57 = vsel %vm74_vm8, %v643_v37, %v633_v24 }
 0x2f7   :  { %v654_v16 = vmul.f32 %v645_v29, %v1451_v10  ;;  %v655_v11 = vmul.f32 %v646_v57, %v1455_v30 }
 0x2f9   :  { %v660_v34 = vpop.permute.xlu1 %659 }
 0x2fa   :  { %v665_v36 = vsel %vm112_vm6, %v660_v34, %v662_v50  ;;  %v672_v63 = vsel %vm112_vm6, %v657_v49, %v660_v34 }
 0x2fb   :  { %v673_v9 = vmul.f32 %v672_v63, %v1676_v13  ;;  %v674_v18 = vmul.f32 %v665_v36, %v1677_v46 }
 0x2fd   :  { %v808_v58 = vpack.c.bf16 %v673_v9, %v652_v14  ;;  %v664_v15 = vpop.permute.xlu1 %663  ;;  %v809_v32 = vpack.c.bf16 %v674_v18, %v653_v4 }
 0x2fe   :  { %v666_v5 = vsel %vm112_vm6, %v662_v50, %v664_v15  ;;  %v667_v8 = vsel %vm112_vm6, %v664_v15, %v657_v49 }
 0x2ff   :  { %v675_v19 = vmul.f32 %v666_v5, %v1410_v59  ;;  %v676_v28 = vmul.f32 %v667_v8, %v1429_v39  ;;  %858 = vmatprep.subr.bf16.mxu0 %v809_v32 }
 0x300   :  { %859 = vmatpush1.bf16.msra.mxu0 %v808_v58 }
 0x301   :  { %v810_v26 = vpack.c.bf16 %v675_v19, %v654_v16  ;;  %v811_v23 = vpack.c.bf16 %v676_v28, %v655_v11 }
 0x303   :  { %959 = vmatmul.mubr.msk.bf16.vlgmr.msra.gmra.mxu0 %vm828_vm11, %v807_v1  ;;  %899 = vmatprep.subr.bf16.mxu1 %v811_v23 }
 0x304   :  { %900 = vmatpush1.bf16.msra.mxu1 %v810_v26 }
 0x307   :  { %961 = vmatmul.mubr.msk.bf16.vlgmr.msra.gmra.mxu1 %vm828_vm11, %v807_v1 }
 0x3c3   :  { %v878_v10 = vpop.f32.mrf.mxu0 }
 0x3c4   :  { %v926_v20 = vmax.f32 %v878_v10, 0.0 }
 0x3c5   :  { %v880_v30 = vpop.f32.mrf.mxu0 }
 0x3c6   :  { %930 = vst [vmem:[#allocation7] sm:$0xff] %v926_v20  ;;  %v927_v59 = vmax.f32 %v880_v30, 0.0 }
 0x3c7   :  { %v882_v60 = vpop.f32.mrf.mxu0  ;;  %v919_v39 = vpop.f32.mrf.mxu1 }
 0x3c8   :  { %931 = vst [vmem:[#allocation7 + $0x8] sm:$0xff] %v927_v59  ;;  %v928_v43 = vmax.f32 %v919_v39, 0.0 }
 0x3c9   :  { %v883_v61 = vpop.f32.mrf.mxu0  ;;  %v921_v56 = vpop.f32.mrf.mxu1 }
 0x3ca   :  { %932 = vst [vmem:[#allocation7 + $0x10] sm:$0xff] %v928_v43  ;;  %v929_v24 = vmax.f32 %v921_v56, 0.0 }
 0x3cb   :  { %v923_v62 = vpop.f32.mrf.mxu1 }
 0x3cc   :  { %933 = vst [vmem:[#allocation7 + $0x18] sm:$0xff] %v929_v24 }
 0x3cd   :  { %v924_v7 = vpop.f32.mrf.mxu1 }
 0x3ce   :  { %1033 = shalt.err (!%p1030_p0)
}
 0x3cf   :  { %943 = dma.vmem_to_hbm [thread:$0]  %s941_s23, 512, %s1656_s6, [#allocation4]  }
 0x3d0   :  { %1046 = dma.done.wait [#allocation4], 512  }
 0x3d1   :  { %1047 = vsyncadd [#allocation4], 4294966784 }
 0x3d2   :  { %947 = vsyncpa [#allocation3], 1 }
 0x3d3   :  { %948 = vsyncpa [#allocation6], 1 }
 0x3d4   :  { %949 = vsyncpa [#allocation4], 1 }

</bundles_post_ra>
